<compile_context>
chip_gen: v6e
topology: v6e:2x2x1
jax: 0.10.0
libtpu: 0.0.40
codegen_flags: <defaults>
</compile_context>

<pallas_src>
import functools

import jax
import jax.numpy as jnp
from jax.experimental import pallas as pl
from jax.experimental.pallas import tpu as pltpu

H1 = 5  # hidden width of linear_01 (only used for parameter init / reference)


def circles_kernel(p_ref, x_ref, o_ref):
    """Collapsed affine map, batch dense on sublanes and lanes.

    p_ref: (3,) f32 in SMEM: [a0, a1, c] where a = w2 @ w1, c = w2 @ b1 + b2
    x_ref: (2, R, 128) f32 block  (feature on dim 0, batch on (R, 128))
    o_ref: (R, 128)    f32 block  (lane- and sublane-dense output)
    """
    x0 = x_ref[0]  # (R, 128)
    x1 = x_ref[1]  # (R, 128)
    # Bias folded into the second term; pure VPU, no MXU.
    o_ref[...] = (x0 * p_ref[0] + (x1 * p_ref[1] + p_ref[2])).astype(o_ref.dtype)


def collapse_params(params):
    """Fold Linear(2,5) -> Linear(5,1) into a single affine map y = x @ a + c."""
    w1, b1, w2, b2 = params                    # PyTorch layout: (5,2),(5,),(1,5),(1,)
    a = (w2 @ w1).reshape(-1)                  # (2,)
    c = (w2 @ b1 + b2).reshape(-1)             # (1,)
    return jnp.concatenate([a, c]).astype(jnp.float32)  # (3,) -> SMEM


@functools.partial(jax.jit, static_argnames=("block_rows",))
def circles_forward(x, params, block_rows=2048):
    """x: (B, 2) f32 -> (B, 1) f32, matching Circles.forward.

    block_rows: sublane rows per grid step (multiple of 8); each step processes
    block_rows*128 batch elements.  The default (2048) keeps double-buffered
    VMEM use ~6 MiB, safe on v5e/v6e/v7x; raise on v6e (and set
    vmem_limit_bytes) if you want to push even closer to the HBM roofline.
    """
    B = x.shape[0]
    rows_needed = -(-B // 128)                       # cdiv over the lane axis
    rows_rounded = -(-rows_needed // 8) * 8          # round up to a multiple of 8
    br = min(block_rows, rows_rounded)               # don't pad tiny batches to huge tiles
    n_blocks = -(-rows_needed // br)
    rows_total = n_blocks * br
    Bp = rows_total * 128

    # Lane/sublane-major batch layout: (2, Bp) -> (2, rows_total, 128).
    # TODO(synk): the transpose+pad is a wrapper-side XLA copy; for very large B
    # consider streaming the natural (B, 2) layout and deinterleaving in-kernel.
    xt = jnp.pad(x.astype(jnp.float32).T, ((0, 0), (0, Bp - B)))
    xt = xt.reshape(2, rows_total, 128)

    packed = collapse_params(params)

    out = pl.pallas_call(
        circles_kernel,
        out_shape=jax.ShapeDtypeStruct((rows_total, 128), jnp.float32),
        grid=(n_blocks,),
        in_specs=[
            pl.BlockSpec(memory_space=pltpu.MemorySpace.SMEM),      # 3 scalars, resident
            pl.BlockSpec((2, br, 128), lambda i: (0, i, 0)),        # x tile, batch dense
        ],
        out_specs=pl.BlockSpec((br, 128), lambda i: (i, 0)),        # dense output tile
        compiler_params=pltpu.CompilerParams(
            dimension_semantics=("parallel",),  # shard batch blocks across TCs (v7x)
        ),
    )(packed, xt)

    # (rows_total, 128) row-major flatten recovers batch order; free reshape + slice.
    return out.reshape(-1)[:B, None]


def init_params(key):
    """Mirror nn.Linear init U(-1/sqrt(fan_in), 1/sqrt(fan_in)); PyTorch (out, in) layout."""
    def linear(k, fan_in, fan_out):
        kw, kb = jax.random.split(k)
        bound = 1.0 / (fan_in ** 0.5)
        w = jax.random.uniform(kw, (fan_out, fan_in), jnp.float32, -bound, bound)
        b = jax.random.uniform(kb, (fan_out,), jnp.float32, -bound, bound)
        return w, b

    k1, k2 = jax.random.split(key)
    w1, b1 = linear(k1, 2, H1)
    w2, b2 = linear(k2, H1, 1)
    return (w1, b1, w2, b2)


def reference_forward(x, params):
    w1, b1, w2, b2 = params
    h = x @ w1.T + b1        # linear_01
    return h @ w2.T + b2     # linear_02 (no activation, per the module)


if __name__ == "__main__":
    key = jax.random.PRNGKey(0)
    kx, kp = jax.random.split(key)
    params = init_params(kp)

    # Case 1: small batch, single grid step with the default (clamped) block.
    B1 = 1000  # deliberately not a multiple of 128 to exercise the padded tail
    x1 = jax.random.normal(kx, (B1, 2), dtype=jnp.float32)
    out1 = jax.block_until_ready(circles_forward(x1, params))
    ref1 = reference_forward(x1, params)
    assert out1.shape == (B1, 1)
    assert jnp.allclose(out1, ref1, atol=1e-5, rtol=1e-4), "mismatch vs reference (case 1)"

    # Case 2: force a multi-block grid (block_rows=8 -> 3 grid steps).
    B2 = 3000
    x2 = jax.random.normal(jax.random.fold_in(kx, 1), (B2, 2), dtype=jnp.float32)
    out2 = jax.block_until_ready(circles_forward(x2, params, block_rows=8))
    ref2 = reference_forward(x2, params)
    assert out2.shape == (B2, 1)
    assert jnp.allclose(out2, ref2, atol=1e-5, rtol=1e-4), "mismatch vs reference (case 2)"

    print("KERNEL_OK")
</pallas_src>

<mosaic_0001>
module attributes {stable_mosaic.version = 11 : i64} {
  func.func @circles_kernel(%arg0: i32, %arg1: memref<3xf32, #tpu.memory_space<smem>>, %arg2: memref<2x8x128xf32, #tpu.memory_space<vmem>>, %arg3: memref<8x128xf32, #tpu.memory_space<vmem>>) attributes {dimension_semantics = [#tpu.dimension_semantics<parallel>], iteration_bounds = array<i64: 1>, scalar_prefetch = 0 : i64, scratch_operands = 0 : i64, tpu.core_type = #tpu.core_type<tc>, window_params = [{transform_indices = @transform_0, window_bounds = array<i64: 3>}, {transform_indices = @transform_1, window_bounds = array<i64: 2, 8, 128>}, {transform_indices = @transform_2, window_bounds = array<i64: 8, 128>}]} {
    %c0 = arith.constant 0 : index
    %c0_0 = arith.constant 0 : index
    %c0_1 = arith.constant 0 : index
    %0 = vector.load %arg2[%c0, %c0_0, %c0_1] : memref<2x8x128xf32, #tpu.memory_space<vmem>>, vector<1x8x128xf32>
    %1 = vector.shape_cast %0 : vector<1x8x128xf32> to vector<8x128xf32>
    %c1 = arith.constant 1 : index
    %c0_2 = arith.constant 0 : index
    %c0_3 = arith.constant 0 : index
    %2 = vector.load %arg2[%c1, %c0_2, %c0_3] : memref<2x8x128xf32, #tpu.memory_space<vmem>>, vector<1x8x128xf32>
    %3 = vector.shape_cast %2 : vector<1x8x128xf32> to vector<8x128xf32>
    %c0_4 = arith.constant 0 : index
    %4 = memref.load %arg1[%c0_4] : memref<3xf32, #tpu.memory_space<smem>>
    %5 = vector.broadcast %4 : f32 to vector<8x128xf32>
    %6 = arith.mulf %1, %5 : vector<8x128xf32>
    %c1_5 = arith.constant 1 : index
    %7 = memref.load %arg1[%c1_5] : memref<3xf32, #tpu.memory_space<smem>>
    %8 = vector.broadcast %7 : f32 to vector<8x128xf32>
    %9 = arith.mulf %3, %8 : vector<8x128xf32>
    %c2 = arith.constant 2 : index
    %10 = memref.load %arg1[%c2] : memref<3xf32, #tpu.memory_space<smem>>
    %11 = vector.broadcast %10 : f32 to vector<8x128xf32>
    %12 = arith.addf %9, %11 : vector<8x128xf32>
    %13 = arith.addf %6, %12 : vector<8x128xf32>
    %c0_6 = arith.constant 0 : index
    %c0_7 = arith.constant 0 : index
    %14 = vector.load %arg3[%c0_6, %c0_7] : memref<8x128xf32, #tpu.memory_space<vmem>>, vector<8x128xf32>
    tpu.vector_store %arg3[%c0_6, %c0_7], %13 {strides = array<i32>} : memref<8x128xf32, #tpu.memory_space<vmem>>, vector<8x128xf32>,
    return
  }
  func.func @transform_0(%arg0: i32) -> i32 {
    %c0_i32 = arith.constant 0 : i32
    %c0_i32_0 = arith.constant 0 : i32
    return %c0_i32 : i32
  }
  func.func @transform_1(%arg0: i32) -> (i32, i32, i32) {
    %c0_i32 = arith.constant 0 : i32
    %c0_i32_0 = arith.constant 0 : i32
    %c0_i32_1 = arith.constant 0 : i32
    return %c0_i32, %arg0, %c0_i32_0 : i32, i32, i32
  }
  func.func @transform_2(%arg0: i32) -> (i32, i32) {
    %c0_i32 = arith.constant 0 : i32
    %c0_i32_0 = arith.constant 0 : i32
    return %arg0, %c0_i32 : i32, i32
  }
}

</mosaic_0001>

<bundles_post_ra>
// kernel: circles_forward.1
= control target key start
LH: loop header
LB: loop body
LE: loop exit
PB: predicated region body
PF: predicated region fallthrough
CT: control target
= control target key end

     0   :  { %7 = vsyncpa [#allocation4], 0  ;;  %s124_s0 = inlined_call_operand.vmem [shape: f32[3], index: 0, kind: input, shape index: {}]   ;;  %s125_s1 = inlined_call_operand.vmem [shape: f32[2,8,128], index: 1, kind: input, shape index: {}]   ;;  %s126_s2 = inlined_call_operand.hbm [shape: f32[8,128], index: 2, kind: output, shape index: {}]  }
   0x1   :  { %8 = vsyncpa [#allocation3], 0  ;;  %s15_s11 = sshll.u32 %s124_s0, 4  ;;  %s16_s11 = int_to_ptr.vmem [resolvable:$true] %s15_s11 }
   0x2   :  { %s59_s12 = scalar_lea.vmem %s16_s11, 16  ;;  %p64_p1 = scmp.lt.s32.totalorder %s16_s11, %s16_s11 }
   0x3   :  { %p60_p0 = scmp.ne.s32.totalorder %s16_s11, %s59_s12  ;;  %p65_p2 = scmp.lt.s32.totalorder %s59_s12, %s59_s12 }
   0x5   :  { %p66_p3 = por %p65_p2, %p64_p1 }
   0x7   :  { %p67_p4 = pnand %p66_p3, %p60_p0 }
   0x9   :  { %70 = shalt.err (!%p67_p4)
}
   0xa   :  { %s95_s13 = smov [#allocation2]  }
   0xb   :  { %18 = dma.vmem_to_smem %s16_s11, 16, %s95_s13, [#allocation4]  }
   0xc   :  { %91 = dma.done.wait [#allocation4], 16  }
   0xd   :  { %92 = vsyncadd [#allocation4], 4294967280 }
   0xe   :  { %24 = sfence }
   0xf   :  { %s28_s14 = sld [smem:[#allocation2]]  ;;  %v25_v0 = vld [vmem:[%s125_s1] sm:$0xff]  ;;  %v54_v1 = vld [vmem:[%s125_s1 + $0x8] sm:$0xff]  ;;  %s96_s20 = smov [#allocation5]  }
  0x10   :  { %s55_s15 = sld [smem:[#allocation2 + $0x1]]  ;;  %s45_s21 = sshll.u32 %s96_s20, 4  ;;  %s46_s21 = int_to_ptr.vmem [resolvable:$true] %s45_s21 }
  0x11   :  { %s56_s16 = sld [smem:[#allocation2 + $0x2]]  ;;  %s71_s22 = scalar_lea.vmem %s46_s21, 128 }
  0x12   :  { %p72_p5 = scmp.ne.s32.totalorder %s46_s21, %s71_s22  ;;  %p76_p6 = scmp.lt.s32.totalorder %s46_s21, %s46_s21 }
  0x13   :  { %p77_p7 = scmp.lt.s32.totalorder %s71_s22, %s71_s22 }
  0x15   :  { %v29_v2 = vstv %s28_s14  ;;  %p78_p8 = por %p77_p7, %p76_p6 }
  0x16   :  { %v32_v3 = vstv %s55_s15  ;;  %v30_v4 = vmul.f32 %v29_v2, %v25_v0 }
  0x17   :  { %v33_v5 = vmul.f32 %v54_v1, %v32_v3  ;;  %v35_v6 = vstv %s56_s16  ;;  %p79_p9 = pnand %p78_p8, %p72_p5 }
  0x19   :  { %v36_v7 = vadd.f32 %v35_v6, %v33_v5 }
  0x1b   :  { %v37_v8 = vadd.f32 %v36_v7, %v30_v4 }
  0x1d   :  { %38 = vst [vmem:[#allocation5] sm:$0xff] %v37_v8 }
  0x1e   :  { %82 = shalt.err (!%p79_p9)
}
  0x1f   :  { %48 = dma.vmem_to_hbm [thread:$0]  %s46_s21, 128, %s126_s2, [#allocation3]  }
  0x20   :  { %93 = dma.done.wait [#allocation3], 128  }
  0x21   :  { %94 = vsyncadd [#allocation3], 4294967168 }
  0x22   :  { %52 = vsyncpa [#allocation3], 1 }
  0x23   :  { %53 = vsyncpa [#allocation4], 1 }

</bundles_post_ra>
